<compile_context>
chip_gen: v7x
topology: tpu7x:2x2x1
jax: 0.10.0
libtpu: 0.0.40
codegen_flags: <defaults>
</compile_context>

<pallas_src>
import functools

import jax
import jax.numpy as jnp
from jax.experimental import pallas as pl
from jax.experimental.pallas import tpu as pltpu


def _pconv_kernel(x_ref, w_ref, b_ref, o_ref, win_ref, *, ks, tile_l):
    # x_ref:   (1, C_in, tile_l)        current L-tile, NCL layout (L on lanes)
    # w_ref:   (ks, C_out, C_in)        weights, tap-major
    # b_ref:   (C_out, 1)
    # o_ref:   (1, C_out, tile_l)
    # win_ref: VMEM (C_in, tile_l + halo) scratch window:
    #          [ halo carried from previous tile | current tile ]
    halo = ks - 1
    cur = x_ref[0]                                    # (C_in, tile_l)

    if halo > 0:
        # First L-tile of each batch row: the causal left-pad is a zero halo.
        @pl.when(pl.program_id(1) == 0)
        def _():
            win_ref[:, :halo] = jnp.zeros((x_ref.shape[1], halo), win_ref.dtype)

        # Stage the current tile to the right of the carried halo.
        win_ref[:, halo:] = cur

    def tap(k):
        if halo > 0:
            xk = win_ref[:, k:k + tile_l]             # shifted causal window
        else:
            xk = cur
        return jnp.dot(w_ref[k], xk, preferred_element_type=jnp.float32)

    # ks is a static Python int -> unrolled MXU matmuls, f32 accumulation.
    acc = tap(0)
    for k in range(1, ks):
        acc = acc + tap(k)

    if halo > 0:
        # Stash this tile's right edge as the next tile's halo.
        win_ref[:, :halo] = cur[:, tile_l - halo:]

    o_ref[0] = (acc + b_ref[...].astype(jnp.float32)).astype(o_ref.dtype)


def _pick_tile_l(L, max_tile):
    """Largest lane-aligned tile <= max_tile that divides L (or the full L)."""
    if L <= max_tile:
        return L
    for cand in range(max_tile - max_tile % 128, 127, -128):
        if L % cand == 0:
            return cand
    return L


def pconv(x, weight, bias, kernel_size, *, max_tile_l=512):
    """Causal 1D conv matching Pconv.forward.

    x:      (N, C_in, L)   float32
    weight: (C_out, C_in, ks)
    bias:   (C_out,)
    returns (N, C_out, L)
    """
    ks = int(kernel_size)
    N, C_in, L = x.shape
    C_out = weight.shape[0]
    halo = ks - 1

    tile_l = _pick_tile_l(L, max_tile_l)
    num_tiles = L // tile_l
    assert tile_l * num_tiles == L
    assert tile_l >= max(halo, 1), "L tile must be at least ks-1 wide"

    # Only the (tiny) weight tensor is reshuffled; x / out keep NCL layout so the
    # wrapper does no extra HBM passes over the big tensors.
    w_koi = jnp.transpose(weight, (2, 0, 1))          # (ks, C_out, C_in)
    b_col = bias.reshape(C_out, 1)

    out = pl.pallas_call(
        functools.partial(_pconv_kernel, ks=ks, tile_l=tile_l),
        out_shape=jax.ShapeDtypeStruct((N, C_out, L), x.dtype),
        grid=(N, num_tiles),
        in_specs=[
            pl.BlockSpec((1, C_in, tile_l), lambda n, j: (n, 0, j)),
            pl.BlockSpec((ks, C_out, C_in), lambda n, j: (0, 0, 0)),   # resident
            pl.BlockSpec((C_out, 1), lambda n, j: (0, 0)),             # resident
        ],
        out_specs=pl.BlockSpec((1, C_out, tile_l), lambda n, j: (n, 0, j)),
        scratch_shapes=[pltpu.VMEM((C_in, tile_l + halo), x.dtype)],
        compiler_params=pltpu.CompilerParams(
            # Batch rows are independent; the L-tile axis carries the halo in
            # scratch, so it must stay sequential ("arbitrary").
            dimension_semantics=("parallel", "arbitrary"),
            # Explicit limit with headroom (v7x has only 64 MiB physical VMEM).
            vmem_limit_bytes=48 * 1024 * 1024,
        ),
    )(x, w_koi, b_col)
    return out


def _reference(x, weight, bias, ks):
    L = x.shape[-1]
    x_pad = jnp.pad(x, ((0, 0), (0, 0), (ks - 1, 0)))
    windows = jnp.stack([x_pad[:, :, k:k + L] for k in range(ks)], axis=-1)  # (N,C_in,L,ks)
    return jnp.einsum("nclk,ock->nol", windows, weight) + bias[None, :, None]


if __name__ == "__main__":
    key = jax.random.PRNGKey(0)
    k_x, k_w, k_b = jax.random.split(key, 3)

    # Small shapes consistent with nn.Conv1d(in_channels=4, out_channels=8, kernel_size=3)
    N, C_in, C_out, L, ks = 2, 4, 8, 16, 3

    x = jax.random.normal(k_x, (N, C_in, L), dtype=jnp.float32)
    # Deterministic parameter init (PyTorch-style uniform bound), not a checkpoint load.
    bound = 1.0 / (C_in * ks) ** 0.5
    weight = jax.random.uniform(k_w, (C_out, C_in, ks), jnp.float32, -bound, bound)
    bias = jax.random.uniform(k_b, (C_out,), jnp.float32, -bound, bound)

    out = pconv(x, weight, bias, ks)
    out = jax.block_until_ready(out)
    ref = _reference(x, weight, bias, ks)
    assert out.shape == (N, C_out, L)
    assert jnp.allclose(out, ref, atol=1e-5, rtol=1e-5), "mismatch vs reference"

    # Second, slightly longer sequence to exercise the multi-tile halo carry path.
    L2 = 256
    x2 = jax.random.normal(jax.random.PRNGKey(1), (N, C_in, L2), dtype=jnp.float32)
    out2 = jax.block_until_ready(pconv(x2, weight, bias, ks, max_tile_l=128))
    ref2 = _reference(x2, weight, bias, ks)
    assert out2.shape == (N, C_out, L2)
    assert jnp.allclose(out2, ref2, atol=1e-5, rtol=1e-5), "mismatch vs reference (tiled)"

    print("KERNEL_OK")
</pallas_src>

<mosaic_0001>
module attributes {stable_mosaic.version = 11 : i64} {
  func.func @_pconv_kernel(%arg0: i32, %arg1: i32, %arg2: memref<1x4x16xf32, #tpu.memory_space<vmem>>, %arg3: memref<3x8x4xf32, #tpu.memory_space<vmem>>, %arg4: memref<8x1xf32, #tpu.memory_space<vmem>>, %arg5: memref<1x8x16xf32, #tpu.memory_space<vmem>>, %arg6: memref<4x18xf32, #tpu.memory_space<vmem>>) attributes {dimension_semantics = [#tpu.dimension_semantics<parallel>, #tpu.dimension_semantics<arbitrary>], iteration_bounds = array<i64: 2, 1>, scalar_prefetch = 0 : i64, scratch_operands = 1 : i64, tpu.core_type = #tpu.core_type<tc>, window_params = [{transform_indices = @transform_0, window_bounds = array<i64: 1, 4, 16>}, {pipeline_mode = #tpu.pipeline_mode<synchronous>, transform_indices = @transform_1, window_bounds = array<i64: 3, 8, 4>}, {pipeline_mode = #tpu.pipeline_mode<synchronous>, transform_indices = @transform_2, window_bounds = array<i64: 8, 1>}, {transform_indices = @transform_3, window_bounds = array<i64: 1, 8, 16>}]} {
    %c0 = arith.constant 0 : index
    %c0_0 = arith.constant 0 : index
    %c0_1 = arith.constant 0 : index
    %0 = vector.load %arg2[%c0, %c0_0, %c0_1] : memref<1x4x16xf32, #tpu.memory_space<vmem>>, vector<1x4x16xf32>
    %1 = vector.shape_cast %0 : vector<1x4x16xf32> to vector<4x16xf32>
    %c0_i32 = arith.constant 0 : i32
    %2 = arith.cmpi eq, %arg1, %c0_i32 : i32
    %3 = arith.extui %2 : i1 to i32
    %c0_i32_2 = arith.constant 0 : i32
    %4 = arith.cmpi ne, %3, %c0_i32_2 : i32
    scf.if %4 {
      %cst_27 = arith.constant 0.000000e+00 : f32
      %28 = vector.broadcast %cst_27 : f32 to vector<4x2xf32>
      %c0_28 = arith.constant 0 : index
      %c0_29 = arith.constant 0 : index
      %29 = vector.load %arg6[%c0_28, %c0_29] : memref<4x18xf32, #tpu.memory_space<vmem>>, vector<4x2xf32>
      tpu.vector_store %arg6[%c0_28, %c0_29], %28 {strides = array<i32>} : memref<4x18xf32, #tpu.memory_space<vmem>>, vector<4x2xf32>,
    } else {
    }
    %c0_3 = arith.constant 0 : index
    %c2 = arith.constant 2 : index
    %5 = vector.load %arg6[%c0_3, %c2] : memref<4x18xf32, #tpu.memory_space<vmem>>, vector<4x16xf32>
    tpu.vector_store %arg6[%c0_3, %c2], %1 {strides = array<i32>} : memref<4x18xf32, #tpu.memory_space<vmem>>, vector<4x16xf32>,
    %c0_4 = arith.constant 0 : index
    %c0_5 = arith.constant 0 : index
    %6 = vector.load %arg6[%c0_4, %c0_5] : memref<4x18xf32, #tpu.memory_space<vmem>>, vector<4x16xf32>
    %c0_6 = arith.constant 0 : index
    %c0_7 = arith.constant 0 : index
    %c0_8 = arith.constant 0 : index
    %7 = vector.load %arg3[%c0_6, %c0_7, %c0_8] : memref<3x8x4xf32, #tpu.memory_space<vmem>>, vector<1x8x4xf32>
    %8 = vector.shape_cast %7 : vector<1x8x4xf32> to vector<8x4xf32>
    %cst = arith.constant dense<0.000000e+00> : vector<8x16xf32>
    %9 = tpu.matmul %8, %6, %cst {dimension_numbers = #tpu.dot_dimension_numbers<[1], [0], [0], [1], [0, 0, 1, 1], [], []>} : vector<8x4xf32>, vector<4x16xf32>, vector<8x16xf32> -> vector<8x16xf32>
    %c0_9 = arith.constant 0 : index
    %c1 = arith.constant 1 : index
    %10 = vector.load %arg6[%c0_9, %c1] : memref<4x18xf32, #tpu.memory_space<vmem>>, vector<4x16xf32>
    %c1_10 = arith.constant 1 : index
    %c0_11 = arith.constant 0 : index
    %c0_12 = arith.constant 0 : index
    %11 = vector.load %arg3[%c1_10, %c0_11, %c0_12] : memref<3x8x4xf32, #tpu.memory_space<vmem>>, vector<1x8x4xf32>
    %12 = vector.shape_cast %11 : vector<1x8x4xf32> to vector<8x4xf32>
    %cst_13 = arith.constant dense<0.000000e+00> : vector<8x16xf32>
    %13 = tpu.matmul %12, %10, %cst_13 {dimension_numbers = #tpu.dot_dimension_numbers<[1], [0], [0], [1], [0, 0, 1, 1], [], []>} : vector<8x4xf32>, vector<4x16xf32>, vector<8x16xf32> -> vector<8x16xf32>
    %14 = arith.addf %9, %13 : vector<8x16xf32>
    %c0_14 = arith.constant 0 : index
    %c2_15 = arith.constant 2 : index
    %15 = vector.load %arg6[%c0_14, %c2_15] : memref<4x18xf32, #tpu.memory_space<vmem>>, vector<4x16xf32>
    %c2_16 = arith.constant 2 : index
    %c0_17 = arith.constant 0 : index
    %c0_18 = arith.constant 0 : index
    %16 = vector.load %arg3[%c2_16, %c0_17, %c0_18] : memref<3x8x4xf32, #tpu.memory_space<vmem>>, vector<1x8x4xf32>
    %17 = vector.shape_cast %16 : vector<1x8x4xf32> to vector<8x4xf32>
    %cst_19 = arith.constant dense<0.000000e+00> : vector<8x16xf32>
    %18 = tpu.matmul %17, %15, %cst_19 {dimension_numbers = #tpu.dot_dimension_numbers<[1], [0], [0], [1], [0, 0, 1, 1], [], []>} : vector<8x4xf32>, vector<4x16xf32>, vector<8x16xf32> -> vector<8x16xf32>
    %19 = arith.addf %14, %18 : vector<8x16xf32>
    %20 = vector.extract_strided_slice %1 {offsets = [0, 14], sizes = [4, 2], strides = [1, 1]} : vector<4x16xf32> to vector<4x2xf32>
    %c0_20 = arith.constant 0 : index
    %c0_21 = arith.constant 0 : index
    %21 = vector.load %arg6[%c0_20, %c0_21] : memref<4x18xf32, #tpu.memory_space<vmem>>, vector<4x2xf32>
    tpu.vector_store %arg6[%c0_20, %c0_21], %20 {strides = array<i32>} : memref<4x18xf32, #tpu.memory_space<vmem>>, vector<4x2xf32>,
    %c0_22 = arith.constant 0 : index
    %c0_23 = arith.constant 0 : index
    %22 = vector.load %arg4[%c0_22, %c0_23] : memref<8x1xf32, #tpu.memory_space<vmem>>, vector<8x1xf32>
    %23 = vector.broadcast %22 : vector<8x1xf32> to vector<8x16xf32>
    %24 = arith.addf %19, %23 : vector<8x16xf32>
    %c0_24 = arith.constant 0 : index
    %c0_25 = arith.constant 0 : index
    %c0_26 = arith.constant 0 : index
    %25 = vector.load %arg5[%c0_24, %c0_25, %c0_26] : memref<1x8x16xf32, #tpu.memory_space<vmem>>, vector<1x8x16xf32>
    %26 = vector.shape_cast %25 : vector<1x8x16xf32> to vector<8x16xf32>
    %27 = vector.shape_cast %24 : vector<8x16xf32> to vector<1x8x16xf32>
    tpu.vector_store %arg5[%c0_24, %c0_25, %c0_26], %27 {strides = array<i32>} : memref<1x8x16xf32, #tpu.memory_space<vmem>>, vector<1x8x16xf32>,
    return
  }
  func.func @transform_0(%arg0: i32, %arg1: i32) -> (i32, i32, i32) {
    %c0_i32 = arith.constant 0 : i32
    %c0_i32_0 = arith.constant 0 : i32
    return %arg0, %c0_i32, %arg1 : i32, i32, i32
  }
  func.func @transform_1(%arg0: i32, %arg1: i32) -> (i32, i32, i32) {
    %c0_i32 = arith.constant 0 : i32
    %c0_i32_0 = arith.constant 0 : i32
    %c0_i32_1 = arith.constant 0 : i32
    %c0_i32_2 = arith.constant 0 : i32
    return %c0_i32, %c0_i32_0, %c0_i32_1 : i32, i32, i32
  }
  func.func @transform_2(%arg0: i32, %arg1: i32) -> (i32, i32) {
    %c0_i32 = arith.constant 0 : i32
    %c0_i32_0 = arith.constant 0 : i32
    %c0_i32_1 = arith.constant 0 : i32
    return %c0_i32, %c0_i32_0 : i32, i32
  }
  func.func @transform_3(%arg0: i32, %arg1: i32) -> (i32, i32, i32) {
    %c0_i32 = arith.constant 0 : i32
    %c0_i32_0 = arith.constant 0 : i32
    return %arg0, %c0_i32, %arg1 : i32, i32, i32
  }
}

</mosaic_0001>

<bundles_post_ra>
// kernel: tpu_custom_call.1
= control target key start
LH: loop header
LB: loop body
LE: loop exit
PB: predicated region body
PF: predicated region fallthrough
CT: control target
= control target key end

     0   :  { %8 = vsyncpa [#allocation4], 0  ;;  %s890_s0 = inlined_call_operand.vmem [shape: f32[2,4,16], index: 0, kind: input, shape index: {}]   ;;  %s891_s1 = inlined_call_operand.vmem [shape: f32[3,8,4], index: 1, kind: input, shape index: {}]   ;;  %s892_s2 = inlined_call_operand.vmem [shape: f32[8,1], index: 2, kind: input, shape index: {}]   ;;  %s893_s3 = inlined_call_operand.hbm [shape: f32[2,8,16], index: 3, kind: output, shape index: {}]  }
   0x1   :  { %10 = vsyncpa [#allocation4 + $0x1], 0  ;;  %s755_s12 = smov 0   ;;  %s757_s13 = smov 0  }
   0x2   :  { %s759_s14 = smov 0   ;;  %s761_s15 = smov 0  }
   0x3   :  { %s763_s16 = smov 0   ;;  %s765_s17 = smov 0  }
   0x4 LB: > { %s543_s18 = sadd.s32 4294967295, %s725_s17   ;;  %s544_s19 = sadd.s32 4294967294, %s725_s17   ;;  %s725_s17 = sphi %s765_s17, %s16_s17   ;;  %s721_s16 = sphi %s763_s16, %s900_s16   ;;  %s717_s15 = sphi %s761_s15, %s899_s15   ;;  %s713_s14 = sphi %s759_s14, %s898_s14   ;;  %s709_s13 = sphi %s757_s13, %s897_s13   ;;  %s705_s12 = sphi %s755_s12, %s896_s12  }
   0x5   : > { %s28_s20 = sadd.s32 1, %s721_s16  ;;  %s107_s21 = sadd.s32 1, %s713_s14 }
   0x6   : > { %p30_p0 = scmp.ge.s32.totalorder %s28_s20, 2  ;;  %p117_p1 = scmp.ne.s32.totalorder %s713_s14, %s709_s13 }
   0x7   : > { %p118_p2 = scmp.eq.s32.totalorder %s543_s18, 1  ;;  %p123_p3 = scmp.ne.s32.totalorder %s709_s13, %s705_s12 }
   0x8   : > { %s902_s20 = smov (%p30_p0, %s28_s20), 0  ;;  %p124_p5 = scmp.eq.s32.totalorder %s544_s19, 1 }
   0x9   : > { %p795_p4 = por %p118_p2, %p117_p1  ;;  %s102_s23 = ssub.s32 %s721_s16, %s902_s20 }
   0xa   : > { %p547_p6 = scmp.ge.s32.totalorder %s725_s17, 1  ;;  %p105_p7 = scmp.eq.s32.totalorder %s102_s23, 0 }
   0xb   : > { %p802_p8 = por %p124_p5, %p123_p3  ;;  %p158_p9 = scmp.lt.s32.totalorder %s725_s17, 3 }
   0xc   : > { %s808_s25 = scalar_select %p105_p7, %s713_s14, %s107_s21  }
   0xd   : > { %p159_p10 = pnand %p547_p6, %p158_p9 }
   0xe   : > { %p184_p11 = scmp.lt.s32.totalorder (!%p159_p10), %s717_s15, 1  ;;  %vm196_vm0 = vcmask (!%p159_p10), 11264   ;;  %v727_v0 = vmov (!%p159_p10), 0.0   ;;  %s728_s4 = smov (!%p159_p10), 2   ;;  %vm729_vm1 = vmmov (!%p159_p10), 0   ;;  %vm202_vm2 = vcmask (!%p159_p10), 142352  }
   0xf   : > { %162 = sbr.rel (%p159_p10) target bundleno = 500 (0x1f4), region = 32  ;;  %197 = vst.msk [vmem:[#allocation2] sm:$0xf] (!%p159_p10), %vm196_vm0, %v727_v0  ;;  %573 = vmatprep.subr.mxu1 (!%p159_p10), %v727_v0  ;;  %568 = vmatprep.subr.mxu0 (!%p159_p10), %v727_v0  ;;  %v730_v3 = vmov (!%p159_p10), 0   ;;  %vm215_vm3 = vcmask (!%p159_p10), 1043456   ;;  %vm211_vm4 = vcmask (!%p159_p10), 31744  }
  0x10   : > { %570 = vmatprep.mubr.msk.f32.mxu0 (!%p159_p10), %vm729_vm1, %v727_v0  ;;  %575 = vmatprep.mubr.msk.f32.mxu1 (!%p159_p10), %vm729_vm1, %v727_v0  ;;  %v205_v5 = vld [vmem:[%s891_s1] sm:$0xff] (!%p159_p10)  ;;  %s731_s7 = smov (!%p159_p10), 126   ;;  %s732_s8 = smov (!%p159_p10), 127   ;;  %v550_v7 = vld [vmem:[%s891_s1 + $0x8] sm:$0xff] (!%p159_p10)  ;;  %v555_v10 = vld [vmem:[%s891_s1 + $0x10] sm:$0xff] (!%p159_p10)  ;;  %vm455_vm5 = vcmask (!%p159_p10), 130048  }
  0x11   : > { %645 = vset.pattern.permute.xlu1 (!%p159_p10), %v730_v3  ;;  %646 = vset.pattern.permute.xlu0 (!%p159_p10), %v730_v3  ;;  %v448_v6 = vld [vmem:[%s892_s2] sm:$0xff] (!%p159_p10)  ;;  %s733_s11 = smov (!%p159_p10), 114   ;;  %s559_s28 = sshll.u32 (!%p159_p10), %s717_s15, 7 }
  0x12   : > { %s843_s6 = scalar_lea.hbm (!%p159_p10), %s893_s3, %s559_s28 }
  0x16   : > { %s185_s26 = scalar_select %p184_p11, %s717_s15, 1 }
  0x17   : > { %s734_s15 = smov [#allocation3]  }
  0x18   : > { %s549_s27 = sshll.u32 %s185_s26, 2  ;;  %s181_s26 = sand.u32 1, %s709_s13  }
  0x19   : > { %s190_s30 = scalar_lea.vmem %s890_s0, %s549_s27  ;;  %s548_s27 = sshll.u32 %s181_s26, 3 }
  0x1a   : > { %v191_v1 = vld [vmem:[%s190_s30] sm:$0xf]  ;;  %s183_s29 = scalar_lea.vmem [#allocation3], %s548_s27  ;;  %s651_s9 = sshll.u32 %s734_s15, 4  ;;  %s652_s9 = int_to_ptr.vmem [resolvable:$false] %s651_s9 }
  0x1b   : > { %199 = vrot.lane.b32.xlu0 %v191_v1, %s728_s4  ;;  %s472_s30 = sshll.u32 %s183_s29, 4  ;;  %s653_s10 = scalar_lea.vmem %s652_s9, 256  ;;  %s845_s30 = int_to_ptr.vmem [resolvable:$true] %s472_s30 }
  0x1c   : > { %p654_p1 = scmp.lt.s32.totalorder %s845_s30, %s652_s9 }
  0x8d   : > { %v200_v2 = vpop.permute.xlu0 %199 }
  0x8e   : > { %203 = vst.msk [vmem:[#allocation2] sm:$0xf] %vm202_vm2, %v200_v2 }
  0x95   : > { %v204_v4 = vld [vmem:[#allocation2] sm:$0xf] }
  0x96   : > { %365 = vrot.lane.b32.xlu1 %v204_v4, %s731_s7  ;;  %209 = vrot.lane.b32.xlu0 %v204_v4, %s732_s8  ;;  %s458_s7 = scalar_lea.sflag [#allocation4], %s181_s26  ;;  %s647_s8 = scalar_lea.vmem %s845_s30, 128 }
  0x97   : > { %574 = vmatpush3.msk.msra.mxu1 %vm215_vm3, %v204_v4  ;;  %p648_p12 = scmp.ne.s32.totalorder %s845_s30, %s647_s8  ;;  %p655_p2 = scmp.lt.s32.totalorder %s653_s10, %s647_s8 }
  0x98   : > { %576 = vmatmul.mubr.msk.f32.vlgmr.msra.gmra.mrb[0].mxu1 %vm211_vm4, %v205_v5 }
  0x99   : > { %p649_p13 = pnand %p648_p12, %p795_p4  ;;  %p656_p3 = por %p655_p2, %p654_p1 }
  0x9a   : > { %451 = vperm.xlu1 %645, %v448_v6   ;;  %443 = vrot.lane.b32.xlu0 %v191_v1, %s733_s11 }
  0x9b   : > { %p650_p0 = pneg %p649_p13 }
  0x9d   : > { %p657_p5 = pnand %p656_p3, %p650_p0 }
 0x108   : > { %v210_v8 = vpop.permute.xlu0 %209  ;;  %v366_v9 = vpop.permute.xlu1 %365 }
 0x109   : > { %569 = vmatpush3.msk.msra.mxu0 %vm215_vm3, %v210_v8 }
 0x10a   : > { %571 = vmatmul.mubr.msk.f32.vlgmr.msra.gmra.mrb[0].mxu0 %vm211_vm4, %v550_v7  ;;  %578 = vmatprep.subr.mxu0 %v727_v0 }
 0x10b   : > { %579 = vmatpush3.msk.msra.mxu0 %vm215_vm3, %v366_v9  ;;  %580 = vmatprep.mubr.msk.f32.mxu0 %vm729_vm1, %v727_v0 }
 0x10c   : > { %v444_v11 = vpop.permute.xlu0 %443 }
 0x10d   : > { %447 = vst.msk [vmem:[#allocation2] sm:$0xf] %vm196_vm0, %v444_v11 }
 0x10e   : > { %581 = vmatmul.mubr.msk.f32.vlgmr.msra.gmra.mrb[2].mxu0 %vm211_vm4, %v555_v10 }
 0x119   : > { %v452_v18 = vpop.permute.xlu1 %451 }
 0x16b   : > { %v359_v12 = vpop.f32.mrb[0].mxu1 }
 0x16c   : > { %v577_v13 = vpop.f32.mrb[1].mxu1 }
 0x1dd   : > { %v284_v14 = vpop.f32.mrb[0].mxu0 }
 0x1de   : > { %v572_v15 = vpop.f32.mrb[1].mxu0  ;;  %v360_v16 = vadd.f32 %v359_v12, %v284_v14 }
 0x1e1   : > { %v438_v17 = vpop.f32.mrb[2].mxu0 }
 0x1e2   : > { %v442_v19 = vadd.f32 %v438_v17, %v360_v16  ;;  %v582_v20 = vpop.f32.mrb[3].mxu0 }
 0x1e4   : > { %v454_v21 = vadd.f32 %v452_v18, %v442_v19 }
 0x1e6   : > { %456 = vst.msk [vmem:[%s183_s29] sm:$0xff] %vm455_vm5, %v454_v21 }
 0x1e7   : > { %660 = shalt.err (!%p657_p5)
}
 0x1e8   : > { %s661_s11 = scalar_lea.hbm %s843_s6, 128  ;;  %s665_s21 = scalar_lea.hbm %s893_s3, 256 }
 0x1e9   : > { %p662_p6 = scmp.ne.s32.totalorder %s843_s6, %s661_s11  ;;  %p666_p10 = scmp.lt.u32.totalorder %s843_s6, %s893_s3 }
 0x1ea   : > { %p667_p11 = scmp.lt.u32.totalorder %s665_s21, %s661_s11  ;;  %p669_p13 = scmp.lt.u32.totalorder %s661_s11, %s843_s6 }
 0x1eb   : > { %p663_p7 = pnand %p662_p6, %p795_p4 }
 0x1ec   : > { %p668_p12 = por %p667_p11, %p666_p10 }
 0x1ed   : > { %p664_p9 = pneg %p663_p7 }
 0x1ee   : > { %p670_p0 = por %p669_p13, %p668_p12 }
 0x1f0   : > { %p671_p1 = pnand %p670_p0, %p664_p9 }
 0x1f2   : > { %674 = shalt.err (!%p671_p1)
}
 0x1f3   : > { %583 = dma.vmem_to_hbm [thread:$0]  (%p795_p4), %s845_s30, 128, %s843_s6, %s458_s7  }
 0x1f4 PF: > { %p589_p2 = scmp.ge.s32.totalorder %s725_s17, 2  ;;  %s484_s27 = sand.u32 1, %s705_s12  }
 0x1f5   : > { %s485_s28 = scalar_lea.sflag [#allocation4], %s484_s27 }
 0x1f6   : > { %p586_p3 = pnand %p589_p2, %p802_p8 }
 0x1f8   : > { %700 = dma.done.wait (!%p586_p3), %s485_s28, 128  }
 0x1f9   : > { %702 = vsyncadd (!%p586_p3), %s485_s28, 4294967168  ;;  %s16_s17 = sadd.s32 1, %s725_s17   ;;  %s896_s12 = smov %s709_s13 }
 0x1fa   : > { %p13_p5 = scmp.ge.s32.totalorder %s16_s17, 4   ;;  %s897_s13 = smov %s713_s14 }
 0x1fb   : > { %s898_s14 = smov %s808_s25  ;;  %s899_s15 = smov %s721_s16 }
 0x1fc   : > { %s900_s16 = smov %s902_s20  ;;  %15 = sbr.rel (!%p13_p5) target bundleno = 4 (0x4), region = 73 }
 0x203   :  { %490 = vsyncpa [#allocation4], 1 }
 0x204   :  { %492 = vsyncpa [#allocation4 + $0x1], 1 }

</bundles_post_ra>
